<compile_context>
chip_gen: v7x
topology: tpu7x:2x2x1
jax: 0.10.0
libtpu: 0.0.40
codegen_flags: <defaults>
</compile_context>

<pallas_src>
import functools

import jax
import jax.numpy as jnp
from jax.experimental import pallas as pl
from jax.experimental.pallas import tpu as pltpu

_LANES = 128
_SUBLANES = 8
_CHUNK = _SUBLANES * _LANES   # 1024: pad granule so the lane-dense view has rows % 8 == 0


def _cdiv(a, b):
    return (a + b - 1) // b


def _round_up(x, m):
    return ((x + m - 1) // m) * m


def _maybe_buffered_spec(block_shape, index_map, buffers):
    """Input BlockSpec with pipeline_mode=pl.Buffered(n) when available.

    Falls back to the default double-buffered BlockSpec if this JAX build does
    not expose the deeper-pipelining API (perf-sweep item from the review)."""
    buffered = getattr(pl, "Buffered", None)
    if buffered is not None and buffers is not None and buffers > 2:
        try:
            return pl.BlockSpec(block_shape, index_map,
                                pipeline_mode=buffered(buffers))
        except TypeError:
            pass
    return pl.BlockSpec(block_shape, index_map)


def _elem_kernel(x_ref, o_ref, *, neg_two_scale, loss_weight):
    # x_ref / o_ref: (tile_rows, 128) f32, lane-dense.  Partial edge blocks are
    # clipped on writeback; padded lanes are sliced off in the wrapper.
    loss = jnp.exp(x_ref[...] * neg_two_scale)
    if loss_weight != 1.0:
        loss = loss * loss_weight
    o_ref[...] = loss


def _reduce_kernel(x_ref, part_ref, *, neg_two_scale, batch, tile_rows,
                   tiles_per_split):
    # x_ref:    (tile_rows, 128) f32 VMEM block (lane-dense scale values).
    # part_ref: (8, 128) f32 VMEM output block, resident across the inner
    #           'arbitrary' axis (one per core-split index) -> accumulator.
    c = pl.program_id(0)           # core-split ('parallel') axis
    i = pl.program_id(1)           # row-tile  ('arbitrary') axis
    full = tile_rows * _LANES
    # Valid elements remaining in this tile.  int32 is fine for any realistic
    # batch (< 2**31 padded elements).
    t = c * tiles_per_split + i    # global row-tile index
    rem = batch - t * full

    @pl.when(i == 0)
    def _init():
        part_ref[...] = jnp.zeros_like(part_ref)

    # EUP exp; loss_weight is folded into the final scalar in the wrapper.
    loss = jnp.exp(x_ref[...] * neg_two_scale)

    # Steady state: every element of the tile is valid -> plain VALU adds into
    # the resident (8,128) block.  No iota / compare / select, no cross-lane
    # reduce, no scalar sync on the per-step critical path.
    @pl.when(rem >= full)
    def _full_tile():
        part_ref[...] += loss.reshape(-1, _SUBLANES, _LANES).sum(axis=0)

    # Only the final tile pays for the padding / out-of-bounds mask.  Fully
    # out-of-range "waste" tiles of the core split (rem <= 0) are skipped
    # entirely (their clamped re-read contributes nothing).
    @pl.when(jnp.logical_and(rem > 0, rem < full))
    def _tail_tile():
        row = jax.lax.broadcasted_iota(jnp.int32, (tile_rows, _LANES), 0)
        lane = jax.lax.broadcasted_iota(jnp.int32, (tile_rows, _LANES), 1)
        masked = jnp.where(row * _LANES + lane < rem, loss, 0.0)
        part_ref[...] += masked.reshape(-1, _SUBLANES, _LANES).sum(axis=0)


def camera_prior_loss(cameras, *, scale=10.0, loss_weight=1.0,
                      reduction="mean", tile_rows=4096,
                      pallas_min_batch=65536, input_buffers=3):
    """Pallas implementation of CameraPriorLoss.forward.

    cameras: (B, C) camera tensor (column 0 = scale parameter, module layout)
             or a contiguous (B,) camera-scale vector (SoA; preferred for the
             Pallas path since it skips the strided column extraction).
    Returns a scalar for 'mean'/'sum', a (B,) array for 'none'.
    """
    assert reduction in ("none", "mean", "sum")
    cameras = jnp.asarray(cameras, dtype=jnp.float32)
    col0 = cameras if cameras.ndim == 1 else cameras[:, 0]
    B = int(col0.shape[0])

    neg_two_scale = -2.0 * float(scale)   # exp(-s*x)**2 == exp(-2*s*x)
    loss_weight = float(loss_weight)

    # Small-B bypass: at realistic batch sizes the pallas_call overhead swamps
    # nanoseconds of math.  pallas_min_batch=0 forces the Pallas path.
    if B < pallas_min_batch:
        loss = jnp.exp(col0 * neg_two_scale) * loss_weight
        if reduction == "mean":
            return loss.mean()
        if reduction == "sum":
            return loss.sum()
        return loss

    # Lane-dense (rows, 128) view.  Pad only to the next 1024-element granule
    # (rows % 8 == 0); when B is already aligned nothing is copied at all.
    padded = _round_up(max(B, 1), _CHUNK)
    if padded != B:
        col0 = jnp.pad(col0, (0, padded - B))
    rows = padded // _LANES
    x = col0.reshape(rows, _LANES)

    tile = max(_SUBLANES, min(_round_up(int(tile_rows), _SUBLANES), rows))
    num_blocks = _cdiv(rows, tile)

    if reduction == "none":
        kernel = functools.partial(_elem_kernel, neg_two_scale=neg_two_scale,
                                   loss_weight=loss_weight)
        out = pl.pallas_call(
            kernel,
            out_shape=jax.ShapeDtypeStruct((rows, _LANES), jnp.float32),
            grid_spec=pltpu.PrefetchScalarGridSpec(
                num_scalar_prefetch=0,
                grid=(num_blocks,),
                in_specs=[pl.BlockSpec((tile, _LANES), lambda i: (i, 0))],
                out_specs=pl.BlockSpec((tile, _LANES), lambda i: (i, 0)),
            ),
            compiler_params=pltpu.CompilerParams(
                dimension_semantics=("parallel",)),
        )(x)
        return out.reshape(-1)[:B]

    # 'mean' / 'sum': core-split reduction.  Leading 'parallel' axis shards the
    # row tiles across TensorCores; each split owns a resident (8,128) VMEM
    # output block; the tiny per-split partials are summed in the wrapper.
    n_split = 2 if num_blocks >= 2 else 1
    tiles_per_split = _cdiv(num_blocks, n_split)
    max_blk = num_blocks - 1

    def x_map(c, i):
        # Clamp so "waste" tiles of the split never produce an OOB block index;
        # their contribution is skipped in-kernel (rem <= 0).
        return (jnp.minimum(c * tiles_per_split + i, max_blk), 0)

    buffers = input_buffers if tiles_per_split >= max(3, int(input_buffers)) else None
    kernel = functools.partial(_reduce_kernel, neg_two_scale=neg_two_scale,
                               batch=B, tile_rows=tile,
                               tiles_per_split=tiles_per_split)
    partials = pl.pallas_call(
        kernel,
        out_shape=jax.ShapeDtypeStruct((n_split, _SUBLANES, _LANES),
                                       jnp.float32),
        grid_spec=pltpu.PrefetchScalarGridSpec(
            num_scalar_prefetch=0,
            grid=(n_split, tiles_per_split),
            in_specs=[_maybe_buffered_spec((tile, _LANES), x_map, buffers)],
            out_specs=pl.BlockSpec((None, _SUBLANES, _LANES),
                                   lambda c, i: (c, 0, 0)),
        ),
        compiler_params=pltpu.CompilerParams(
            dimension_semantics=("parallel", "arbitrary")),
    )(x)

    total = partials.sum() * loss_weight      # tiny: n_split*1024 floats
    if reduction == "mean":
        total = total / B
    return total


def _reference(cameras, scale=10.0, loss_weight=1.0, reduction="mean"):
    cameras = jnp.asarray(cameras, dtype=jnp.float32)
    col0 = cameras if cameras.ndim == 1 else cameras[:, 0]
    loss = jnp.power(jnp.exp(-col0 * scale), 2) * loss_weight
    if reduction == "mean":
        return loss.mean()
    if reduction == "sum":
        return loss.sum()
    return loss


if __name__ == "__main__":
    ok = True
    key = jax.random.PRNGKey(0)

    # 1) Small shape matching the module: cameras = (batch, [scale, tx, ty]).
    #    Exercise both the small-B bypass and the forced Pallas path.
    B, C = 2, 3
    cameras = 0.2 * jax.random.normal(key, (B, C), dtype=jnp.float32) + 0.9
    for red in ("mean", "sum", "none"):
        ref = _reference(cameras, 10.0, 1.0, red)
        for min_b in (65536, 0):   # 65536 -> bypass; 0 -> Pallas kernel
            out = jax.block_until_ready(
                camera_prior_loss(cameras, scale=10.0, loss_weight=1.0,
                                  reduction=red, pallas_min_batch=min_b))
            if not jnp.allclose(out, ref, rtol=1e-4, atol=1e-9):
                ok = False
                print(f"MISMATCH B={B} reduction={red} min_b={min_b}")

    # 2) Multi-tile grid + core-split + tail-mask path (small tile on purpose).
    B2, C2 = 2053, 3
    cameras2 = 0.1 * jax.random.normal(jax.random.PRNGKey(0), (B2, C2),
                                       dtype=jnp.float32) + 0.5
    for red in ("mean", "sum", "none"):
        out = jax.block_until_ready(
            camera_prior_loss(cameras2, scale=10.0, loss_weight=2.0,
                              reduction=red, tile_rows=8, pallas_min_batch=0))
        ref = _reference(cameras2, 10.0, 2.0, red)
        if not jnp.allclose(out, ref, rtol=1e-4, atol=1e-9):
            ok = False
            print(f"MISMATCH B={B2} reduction={red}")

    # 3) SoA (B,) input, perfectly aligned (no pad, all steady-state tiles).
    B3 = 4096
    scales3 = 0.1 * jax.random.normal(jax.random.PRNGKey(1), (B3,),
                                      dtype=jnp.float32) + 0.6
    for red in ("mean", "sum", "none"):
        out = jax.block_until_ready(
            camera_prior_loss(scales3, scale=10.0, loss_weight=1.5,
                              reduction=red, tile_rows=8, pallas_min_batch=0))
        ref = _reference(scales3, 10.0, 1.5, red)
        if not jnp.allclose(out, ref, rtol=1e-4, atol=1e-9):
            ok = False
            print(f"MISMATCH B={B3} (SoA) reduction={red}")

    if ok:
        print("KERNEL_OK")
</pallas_src>

<mosaic_0001>
module attributes {stable_mosaic.version = 11 : i64} {
  func.func @_reduce_kernel(%arg0: i32, %arg1: i32, %arg2: memref<8x128xf32, #tpu.memory_space<vmem>>, %arg3: memref<1x8x128xf32, #tpu.memory_space<vmem>>) attributes {dimension_semantics = [#tpu.dimension_semantics<parallel>, #tpu.dimension_semantics<arbitrary>], iteration_bounds = array<i64: 1, 1>, scalar_prefetch = 0 : i64, scratch_operands = 0 : i64, tpu.core_type = #tpu.core_type<tc>, window_params = [{transform_indices = @transform_0, window_bounds = array<i64: 8, 128>}, {transform_indices = @transform_1, window_bounds = array<i64: 1, 8, 128>}]} {
    %c1_i32 = arith.constant 1 : i32
    %0 = arith.muli %arg0, %c1_i32 : i32
    %1 = arith.addi %0, %arg1 : i32
    %c1024_i32 = arith.constant 1024 : i32
    %2 = arith.muli %1, %c1024_i32 : i32
    %c2_i32 = arith.constant 2 : i32
    %3 = arith.subi %c2_i32, %2 : i32
    %c0_i32 = arith.constant 0 : i32
    %4 = arith.cmpi eq, %arg1, %c0_i32 : i32
    %5 = arith.extui %4 : i1 to i32
    %c0_i32_0 = arith.constant 0 : i32
    %6 = arith.cmpi ne, %5, %c0_i32_0 : i32
    scf.if %6 {
      %cst_7 = arith.constant 0.000000e+00 : f32
      %19 = vector.broadcast %cst_7 : f32 to vector<8x128xf32>
      %c0_8 = arith.constant 0 : index
      %c0_9 = arith.constant 0 : index
      %c0_10 = arith.constant 0 : index
      %20 = vector.load %arg3[%c0_8, %c0_9, %c0_10] : memref<1x8x128xf32, #tpu.memory_space<vmem>>, vector<1x8x128xf32>
      %21 = vector.shape_cast %20 : vector<1x8x128xf32> to vector<8x128xf32>
      %22 = vector.shape_cast %19 : vector<8x128xf32> to vector<1x8x128xf32>
      tpu.vector_store %arg3[%c0_8, %c0_9, %c0_10], %22 {strides = array<i32>} : memref<1x8x128xf32, #tpu.memory_space<vmem>>, vector<1x8x128xf32>,
    } else {
    }
    %c0 = arith.constant 0 : index
    %c0_1 = arith.constant 0 : index
    %7 = vector.load %arg2[%c0, %c0_1] : memref<8x128xf32, #tpu.memory_space<vmem>>, vector<8x128xf32>
    %cst = arith.constant -2.000000e+01 : f32
    %8 = vector.broadcast %cst : f32 to vector<8x128xf32>
    %9 = arith.mulf %7, %8 : vector<8x128xf32>
    %10 = math.exp %9 : vector<8x128xf32>
    %c1024_i32_2 = arith.constant 1024 : i32
    %11 = arith.cmpi sge, %3, %c1024_i32_2 : i32
    %12 = arith.extui %11 : i1 to i32
    %c0_i32_3 = arith.constant 0 : i32
    %13 = arith.cmpi ne, %12, %c0_i32_3 : i32
    scf.if %13 {
      %c0_7 = arith.constant 0 : index
      %c0_8 = arith.constant 0 : index
      %c0_9 = arith.constant 0 : index
      %19 = vector.load %arg3[%c0_7, %c0_8, %c0_9] : memref<1x8x128xf32, #tpu.memory_space<vmem>>, vector<1x8x128xf32>
      %20 = vector.shape_cast %19 : vector<1x8x128xf32> to vector<8x128xf32>
      %21 = vector.shape_cast %10 : vector<8x128xf32> to vector<1x8x128xf32>
      %cst_10 = arith.constant dense<0.000000e+00> : vector<8x128xf32>
      %22 = vector.multi_reduction <add>, %21, %cst_10 [0] : vector<1x8x128xf32> to vector<8x128xf32>
      %23 = arith.addf %20, %22 : vector<8x128xf32>
      %c0_11 = arith.constant 0 : index
      %c0_12 = arith.constant 0 : index
      %c0_13 = arith.constant 0 : index
      %24 = vector.load %arg3[%c0_11, %c0_12, %c0_13] : memref<1x8x128xf32, #tpu.memory_space<vmem>>, vector<1x8x128xf32>
      %25 = vector.shape_cast %24 : vector<1x8x128xf32> to vector<8x128xf32>
      %26 = vector.shape_cast %23 : vector<8x128xf32> to vector<1x8x128xf32>
      tpu.vector_store %arg3[%c0_11, %c0_12, %c0_13], %26 {strides = array<i32>} : memref<1x8x128xf32, #tpu.memory_space<vmem>>, vector<1x8x128xf32>,
    } else {
    }
    %c0_i32_4 = arith.constant 0 : i32
    %14 = arith.cmpi sgt, %3, %c0_i32_4 : i32
    %c1024_i32_5 = arith.constant 1024 : i32
    %15 = arith.cmpi slt, %3, %c1024_i32_5 : i32
    %16 = arith.andi %14, %15 : i1
    %17 = arith.extui %16 : i1 to i32
    %c0_i32_6 = arith.constant 0 : i32
    %18 = arith.cmpi ne, %17, %c0_i32_6 : i32
    scf.if %18 {
      %19 = tpu.iota {dimensions = array<i32: 0>} : vector<8x128xi32>
      %20 = tpu.iota {dimensions = array<i32: 1>} : vector<8x128xi32>
      %c128_i32 = arith.constant 128 : i32
      %21 = vector.broadcast %c128_i32 : i32 to vector<8x128xi32>
      %22 = arith.muli %19, %21 : vector<8x128xi32>
      %23 = arith.addi %22, %20 : vector<8x128xi32>
      %24 = vector.broadcast %3 : i32 to vector<8x128xi32>
      %25 = arith.cmpi slt, %23, %24 : vector<8x128xi32>
      %cst_7 = arith.constant 0.000000e+00 : f32
      %26 = vector.broadcast %cst_7 : f32 to vector<8x128xf32>
      %27 = arith.select %25, %10, %26 : vector<8x128xi1>, vector<8x128xf32>
      %c0_8 = arith.constant 0 : index
      %c0_9 = arith.constant 0 : index
      %c0_10 = arith.constant 0 : index
      %28 = vector.load %arg3[%c0_8, %c0_9, %c0_10] : memref<1x8x128xf32, #tpu.memory_space<vmem>>, vector<1x8x128xf32>
      %29 = vector.shape_cast %28 : vector<1x8x128xf32> to vector<8x128xf32>
      %30 = vector.shape_cast %27 : vector<8x128xf32> to vector<1x8x128xf32>
      %cst_11 = arith.constant dense<0.000000e+00> : vector<8x128xf32>
      %31 = vector.multi_reduction <add>, %30, %cst_11 [0] : vector<1x8x128xf32> to vector<8x128xf32>
      %32 = arith.addf %29, %31 : vector<8x128xf32>
      %c0_12 = arith.constant 0 : index
      %c0_13 = arith.constant 0 : index
      %c0_14 = arith.constant 0 : index
      %33 = vector.load %arg3[%c0_12, %c0_13, %c0_14] : memref<1x8x128xf32, #tpu.memory_space<vmem>>, vector<1x8x128xf32>
      %34 = vector.shape_cast %33 : vector<1x8x128xf32> to vector<8x128xf32>
      %35 = vector.shape_cast %32 : vector<8x128xf32> to vector<1x8x128xf32>
      tpu.vector_store %arg3[%c0_12, %c0_13, %c0_14], %35 {strides = array<i32>} : memref<1x8x128xf32, #tpu.memory_space<vmem>>, vector<1x8x128xf32>,
    } else {
    }
    return
  }
  func.func @transform_0(%arg0: i32, %arg1: i32) -> (i32, i32) {
    %c1_i32 = arith.constant 1 : i32
    %0 = arith.muli %arg0, %c1_i32 : i32
    %1 = arith.addi %0, %arg1 : i32
    %c0_i32 = arith.constant 0 : i32
    %2 = arith.minsi %1, %c0_i32 : i32
    %c0_i32_0 = arith.constant 0 : i32
    %c0_i32_1 = arith.constant 0 : i32
    return %2, %c0_i32_0 : i32, i32
  }
  func.func @transform_1(%arg0: i32, %arg1: i32) -> (i32, i32, i32) {
    %c0_i32 = arith.constant 0 : i32
    %c0_i32_0 = arith.constant 0 : i32
    %c0_i32_1 = arith.constant 0 : i32
    return %arg0, %c0_i32, %c0_i32_0 : i32, i32, i32
  }
}

</mosaic_0001>

<bundles_post_ra>
// kernel: tpu_custom_call.1
= control target key start
LH: loop header
LB: loop body
LE: loop exit
PB: predicated region body
PF: predicated region fallthrough
CT: control target
= control target key end

     0   :  { %6 = vsyncpa [#allocation3], 0  ;;  %s174_s0 = inlined_call_operand.hbm [shape: f32[8,128], index: 0, kind: input, shape index: {}]   ;;  %s175_s1 = inlined_call_operand.hbm [shape: f32[1,8,128], index: 1, kind: output, shape index: {}]  }
   0x1   :  { %7 = vsyncpa [#allocation4], 0  ;;  %s138_s6 = smov [#allocation2]   ;;  %s90_s10 = scalar_lea.hbm %s174_s0, 128 }
   0x2   :  { %s19_s7 = sshll.u32 %s138_s6, 4  ;;  %p91_p0 = scmp.ne.s32.totalorder %s174_s0, %s90_s10  ;;  %s20_s7 = int_to_ptr.vmem [resolvable:$true] %s19_s7 }
   0x3   :  { %p94_p1 = scmp.lt.u32.totalorder %s90_s10, %s174_s0 }
   0x5   :  { %p96_p2 = pnand %p94_p1, %p91_p0 }
   0x7   :  { %99 = shalt.err (!%p96_p2)
}
   0x8   :  { %s100_s15 = scalar_lea.vmem %s20_s7, 128  ;;  %p105_p4 = scmp.lt.s32.totalorder %s20_s7, %s20_s7 }
   0x9   :  { %p101_p3 = scmp.ne.s32.totalorder %s20_s7, %s100_s15  ;;  %p106_p5 = scmp.lt.s32.totalorder %s100_s15, %s100_s15 }
   0xb   :  { %p107_p6 = por %p106_p5, %p105_p4 }
   0xd   :  { %p108_p7 = pnand %p107_p6, %p101_p3 }
   0xf   :  { %111 = shalt.err (!%p108_p7)
}
  0x10   :  { %22 = dma.hbm_to_vmem [thread:$0]  %s174_s0, 128, %s20_s7, [#allocation3]  }
  0x11   :  { %134 = dma.done.wait [#allocation3], 128  }
  0x12   :  { %135 = vsyncadd [#allocation3], 4294967168  ;;  %v55_v0 = vlaneseq  ;;  %v37_v1 = vld [vmem:[#allocation2] sm:$0xff]  ;;  %s139_s18 = smov [#allocation5]  }
  0x13   :  { %v38_v2 = vmul.f32 -20.0, %v37_v1  ;;  %s74_s19 = sshll.u32 %s139_s18, 4  ;;  %s75_s19 = int_to_ptr.vmem [resolvable:$true] %s74_s19 }
  0x14   :  { %v56_v3 = vshrl.u32 %v55_v0, 7  ;;  %v58_v5 = vand.u32 127, %v55_v0  ;;  %s112_s20 = scalar_lea.vmem %s75_s19, 128  ;;  %p117_p9 = scmp.lt.s32.totalorder %s75_s19, %s75_s19 }
  0x15   :  { %v39_v4 = vmul.f32 1.442695, %v38_v2  ;;  %p113_p8 = scmp.ne.s32.totalorder %s75_s19, %s112_s20  ;;  %p118_p10 = scmp.lt.s32.totalorder %s112_s20, %s112_s20 }
  0x16   :  { %v59_v6 = vmul.u32 128, %v56_v3 }
  0x17   :  { %88 = vpow2.f32 %v39_v4  ;;  %p119_p11 = por %p118_p10, %p117_p9 }
  0x18   :  { %v60_v7 = vadd.s32 %v59_v6, %v58_v5 }
  0x19   :  { %p120_p12 = pnand %p119_p11, %p113_p8 }
  0x1a   :  { %vm62_vm0 = vcmp.lt.s32.totalorder %v60_v7, 2 }
  0x21   :  { %v89_v8 = vpop.eup %88 }
  0x22   :  { %v63_v9 = vsel %vm62_vm0, %v89_v8, 0.0 }
  0x23   :  { %67 = vst [vmem:[#allocation5] sm:$0xff] %v63_v9 }
  0x24   :  { %123 = shalt.err (!%p120_p12)
}
  0x25   :  { %s124_s22 = scalar_lea.hbm %s175_s1, 128 }
  0x26   :  { %p125_p13 = scmp.ne.s32.totalorder %s175_s1, %s124_s22  ;;  %p128_p0 = scmp.lt.u32.totalorder %s124_s22, %s175_s1 }
  0x28   :  { %p130_p1 = pnand %p128_p0, %p125_p13 }
  0x2a   :  { %133 = shalt.err (!%p130_p1)
}
  0x2b   :  { %77 = dma.vmem_to_hbm [thread:$0]  %s75_s19, 128, %s175_s1, [#allocation4]  }
  0x2c   :  { %136 = dma.done.wait [#allocation4], 128  }
  0x2d   :  { %137 = vsyncadd [#allocation4], 4294967168 }
  0x2e   :  { %81 = vsyncpa [#allocation3], 1 }
  0x2f   :  { %82 = vsyncpa [#allocation4], 1 }

</bundles_post_ra>
